<compile_context>
chip_gen: v7x
topology: tpu7x:2x2x1
jax: 0.10.0
libtpu: 0.0.40
codegen_flags: <defaults>
</compile_context>

<pallas_src>
from functools import partial

import jax
import jax.numpy as jnp
from jax.experimental import pallas as pl
from jax.experimental.pallas import tpu as pltpu


# --------------- Stage 1: per-node projections + source-scaled messages ------
def _msg_kernel(fm_ref, fv_ref, wm_ref, wv_ref, n1_ref, n2_ref, msg_ref, *, gamma):
    mean = jnp.maximum(
        jnp.dot(fm_ref[...], wm_ref[...], preferred_element_type=jnp.float32), 0.0)
    var = jnp.maximum(
        jnp.dot(fv_ref[...], wv_ref[...], preferred_element_type=jnp.float32), 0.0)
    att = jnp.exp(-gamma * var)          # EUP transcendental
    n1 = n1_ref[...]                     # (tm, 1) source-side norms
    n2 = n2_ref[...]
    msg_mean = mean * att * n1
    msg_var = var * att * att * n2
    # One lane-dense (tm, 2*O) write (bf16 by default) instead of two narrow ones.
    msg_ref[...] = jnp.concatenate([msg_mean, msg_var], axis=-1).astype(msg_ref.dtype)
    # TODO(synk): optional bias_mean/bias_var add and self._activation are
    # None/absent for the default constructor args (bias=False, activation=None)
    # and are omitted here.


# --------------- Stage 2: tiled aggregation  out = dest_scale * (A @ msg) ----
def _agg_kernel(adj_ref, msg_ref, n1_ref, n2_ref, out_ref, *, tk, out_feats):
    k = pl.program_id(1)

    @pl.when(k == 0)
    def _():
        out_ref[...] = jnp.zeros_like(out_ref)

    a = adj_ref[...]
    if a.dtype != jnp.bfloat16:
        a = a.astype(jnp.bfloat16)          # 0/1 exact in bf16; MXU-native
    start = pl.multiple_of(k * tk, tk)
    m = msg_ref[pl.ds(start, tk), :]        # slice the resident msg slab in VMEM
    # bf16 x bf16 -> f32 accumulation directly into the resident output block.
    out_ref[...] += jnp.dot(a, m, preferred_element_type=jnp.float32)

    @pl.when(k == pl.num_programs(1) - 1)
    def _():
        # Destination-side scaling: columns [:O] by norm1, [O:] by norm2.
        col = jax.lax.broadcasted_iota(jnp.int32, out_ref.shape, 1)
        scale = jnp.where(col < out_feats, n1_ref[...], n2_ref[...])
        out_ref[...] = out_ref[...] * scale


# --------------- tile / VMEM planning ----------------------------------------
def _divisor_from(n, candidates):
    for t in candidates:
        if n % t == 0:
            return t
    return n


def _plan_stage2(N, O, adj_itemsize, msg_itemsize, tm, tk):
    auto_tm = tm is None
    auto_tk = tk is None
    if auto_tm:
        tm = _divisor_from(N, (512, 256, 128, 64, 32, 16, 8))
    if auto_tk:
        tk = _divisor_from(N, (2048, 1024, 512, 256, 128))

    def footprint(tm_, tk_):
        a = 2 * tm_ * tk_ * adj_itemsize     # double-buffered A tile
        m = 2 * N * 2 * O * msg_itemsize     # resident msg slab (conservative x2)
        o = 2 * tm_ * 2 * O * 4              # f32 output block
        return a + m + o

    budget = 40 << 20                        # headroom under v7x's 64 MiB VMEM
    while auto_tk and footprint(tm, tk) > budget and tk > 128 and N % (tk // 2) == 0:
        tk //= 2
    while auto_tm and footprint(tm, tk) > budget and tm > 8 and N % (tm // 2) == 0:
        tm //= 2
    vmem_limit = int(min(64 << 20, max(32 << 20, footprint(tm, tk) + (8 << 20))))
    return tm, tk, vmem_limit


# --------------- wrapper ------------------------------------------------------
def robust_gcn_conv(adj, feat_mean, feat_var, w_mean, w_var, gamma=1.0,
                    tm=None, tk=None, msg_dtype=jnp.bfloat16):
    """RobustGCNConv forward (bias=False, activation=None).

    adj: dense [N, N] adjacency with adj[dst, src] = 1.0 for edge src->dst.
         Any dtype with exact 0/1 (f32/bf16/int8); bf16/int8 storage halves
         the dominant HBM stream.
    Returns (mean_out, var_out), each [N, out_feats] float32.
    """
    N, F = feat_mean.shape
    O = w_mean.shape[1]
    tm, tk, vmem_limit = _plan_stage2(
        N, O, jnp.dtype(adj.dtype).itemsize, jnp.dtype(msg_dtype).itemsize, tm, tk)
    assert N % tm == 0 and N % tk == 0, "N must be divisible by tm and tk"

    # Degree norms precomputed once (trivial XLA row-sum) on an exact view of A.
    degs = jnp.maximum(jnp.sum(adj.astype(jnp.float32), axis=1, keepdims=True), 1.0)
    norm1 = jax.lax.rsqrt(degs)          # degs**-0.5     (N, 1)
    norm2 = 1.0 / degs                   # norm1**2       (N, 1)

    # ---- Stage 1: msg = [mean*att*norm1 | var*att^2*norm2]  -> (N, 2*O) bf16
    msg = pl.pallas_call(
        partial(_msg_kernel, gamma=float(gamma)),
        out_shape=jax.ShapeDtypeStruct((N, 2 * O), msg_dtype),
        grid=(N // tm,),
        in_specs=[
            pl.BlockSpec((tm, F), lambda i: (i, 0)),
            pl.BlockSpec((tm, F), lambda i: (i, 0)),
            pl.BlockSpec((F, O), lambda i: (0, 0)),
            pl.BlockSpec((F, O), lambda i: (0, 0)),
            pl.BlockSpec((tm, 1), lambda i: (i, 0)),
            pl.BlockSpec((tm, 1), lambda i: (i, 0)),
        ],
        out_specs=pl.BlockSpec((tm, 2 * O), lambda i: (i, 0)),
        compiler_params=pltpu.CompilerParams(
            dimension_semantics=("parallel",)),
    )(feat_mean, feat_var, w_mean, w_var, norm1, norm2)

    # ---- Stage 2: tiled aggregation with resident msg + resident f32 output
    out = pl.pallas_call(
        partial(_agg_kernel, tk=tk, out_feats=O),
        out_shape=jax.ShapeDtypeStruct((N, 2 * O), jnp.float32),
        grid=(N // tm, N // tk),
        in_specs=[
            pl.BlockSpec((tm, tk), lambda i, k: (i, k)),      # A tile (streamed)
            pl.BlockSpec((N, 2 * O), lambda i, k: (0, 0)),    # msg slab (resident)
            pl.BlockSpec((tm, 1), lambda i, k: (i, 0)),       # dest norm1
            pl.BlockSpec((tm, 1), lambda i, k: (i, 0)),       # dest norm2
        ],
        out_specs=pl.BlockSpec((tm, 2 * O), lambda i, k: (i, 0)),
        compiler_params=pltpu.CompilerParams(
            dimension_semantics=("parallel", "arbitrary"),
            vmem_limit_bytes=vmem_limit),
    )(adj, msg, norm1, norm2)

    return out[:, :O], out[:, O:]


# --------------- reference / test ---------------------------------------------
def _xavier_uniform(key, fan_in, fan_out):
    # torch.nn.init.xavier_uniform_ : U(-a, a), a = sqrt(6 / (fan_in + fan_out))
    bound = (6.0 / (fan_in + fan_out)) ** 0.5
    return jax.random.uniform(key, (fan_in, fan_out), jnp.float32,
                              minval=-bound, maxval=bound)


def _reference(adj, feat_mean, feat_var, w_mean, w_var, gamma=1.0):
    mean = jnp.maximum(feat_mean @ w_mean, 0.0)
    var = jnp.maximum(feat_var @ w_var, 0.0)
    att = jnp.exp(-gamma * var)
    degs = jnp.maximum(jnp.sum(adj, axis=1, keepdims=True), 1.0)
    norm1 = degs ** -0.5
    norm2 = norm1 ** 2
    m = adj @ (mean * att * norm1) * norm1
    v = adj @ (var * att * att * norm2) * norm2
    return m, v


if __name__ == "__main__":
    N, IN_FEATS, OUT_FEATS = 256, 64, 64
    gamma = 1.0

    key = jax.random.PRNGKey(0)
    k_adj, k_f0, k_f1, k_wm, k_wv = jax.random.split(key, 5)

    # Random sparse-ish directed graph as a dense adjacency matrix [dst, src].
    adj = jax.random.bernoulli(k_adj, p=0.1, shape=(N, N)).astype(jnp.float32)

    feat_mean = jax.random.normal(k_f0, (N, IN_FEATS), jnp.float32)
    feat_var = jax.random.normal(k_f1, (N, IN_FEATS), jnp.float32)

    # Deterministic Glorot-uniform weights (matches reset_parameters()).
    w_mean = _xavier_uniform(k_wm, IN_FEATS, OUT_FEATS)
    w_var = _xavier_uniform(k_wv, IN_FEATS, OUT_FEATS)

    ref_mean, ref_var = _reference(adj, feat_mean, feat_var, w_mean, w_var, gamma)

    # bf16 msg -> ~2^-8 relative rounding; tolerance loosened accordingly.
    TOL = dict(atol=1e-2, rtol=1e-2)

    # 1) tm=tk=128 -> 2x2 (dst, src) grid: exercises the k-axis accumulation
    #    and in-kernel slicing of the resident msg slab.
    mean_out, var_out = robust_gcn_conv(adj, feat_mean, feat_var,
                                        w_mean, w_var, gamma=gamma,
                                        tm=128, tk=128)
    jax.block_until_ready((mean_out, var_out))
    assert jnp.allclose(mean_out, ref_mean, **TOL), \
        float(jnp.max(jnp.abs(mean_out - ref_mean)))
    assert jnp.allclose(var_out, ref_var, **TOL), \
        float(jnp.max(jnp.abs(var_out - ref_var)))

    # 2) default auto tile plan.
    mean_d, var_d = robust_gcn_conv(adj, feat_mean, feat_var,
                                    w_mean, w_var, gamma=gamma)
    jax.block_until_ready((mean_d, var_d))
    assert jnp.allclose(mean_d, ref_mean, **TOL), \
        float(jnp.max(jnp.abs(mean_d - ref_mean)))
    assert jnp.allclose(var_d, ref_var, **TOL), \
        float(jnp.max(jnp.abs(var_d - ref_var)))

    print("KERNEL_OK")
</pallas_src>

<mosaic_0001>
module attributes {stable_mosaic.version = 11 : i64} {
  func.func @_msg_kernel(%arg0: i32, %arg1: memref<128x64xf32, #tpu.memory_space<vmem>>, %arg2: memref<128x64xf32, #tpu.memory_space<vmem>>, %arg3: memref<64x64xf32, #tpu.memory_space<vmem>>, %arg4: memref<64x64xf32, #tpu.memory_space<vmem>>, %arg5: memref<128x1xf32, #tpu.memory_space<vmem>>, %arg6: memref<128x1xf32, #tpu.memory_space<vmem>>, %arg7: memref<128x128xbf16, #tpu.memory_space<vmem>>) attributes {dimension_semantics = [#tpu.dimension_semantics<parallel>], iteration_bounds = array<i64: 2>, scalar_prefetch = 0 : i64, scratch_operands = 0 : i64, tpu.core_type = #tpu.core_type<tc>, window_params = [{transform_indices = @transform_0, window_bounds = array<i64: 128, 64>}, {transform_indices = @transform_1, window_bounds = array<i64: 128, 64>}, {pipeline_mode = #tpu.pipeline_mode<synchronous>, transform_indices = @transform_2, window_bounds = array<i64: 64, 64>}, {pipeline_mode = #tpu.pipeline_mode<synchronous>, transform_indices = @transform_3, window_bounds = array<i64: 64, 64>}, {transform_indices = @transform_4, window_bounds = array<i64: 128, 1>}, {transform_indices = @transform_5, window_bounds = array<i64: 128, 1>}, {transform_indices = @transform_6, window_bounds = array<i64: 128, 128>}]} {
    %c0 = arith.constant 0 : index
    %c0_0 = arith.constant 0 : index
    %0 = vector.load %arg1[%c0, %c0_0] : memref<128x64xf32, #tpu.memory_space<vmem>>, vector<128x64xf32>
    %c0_1 = arith.constant 0 : index
    %c0_2 = arith.constant 0 : index
    %1 = vector.load %arg3[%c0_1, %c0_2] : memref<64x64xf32, #tpu.memory_space<vmem>>, vector<64x64xf32>
    %cst = arith.constant dense<0.000000e+00> : vector<128x64xf32>
    %2 = tpu.matmul %0, %1, %cst {dimension_numbers = #tpu.dot_dimension_numbers<[1], [0], [0], [1], [0, 0, 1, 1], [], []>} : vector<128x64xf32>, vector<64x64xf32>, vector<128x64xf32> -> vector<128x64xf32>
    %cst_3 = arith.constant 0.000000e+00 : f32
    %3 = vector.broadcast %cst_3 : f32 to vector<128x64xf32>
    %4 = arith.maximumf %2, %3 : vector<128x64xf32>
    %c0_4 = arith.constant 0 : index
    %c0_5 = arith.constant 0 : index
    %5 = vector.load %arg2[%c0_4, %c0_5] : memref<128x64xf32, #tpu.memory_space<vmem>>, vector<128x64xf32>
    %c0_6 = arith.constant 0 : index
    %c0_7 = arith.constant 0 : index
    %6 = vector.load %arg4[%c0_6, %c0_7] : memref<64x64xf32, #tpu.memory_space<vmem>>, vector<64x64xf32>
    %cst_8 = arith.constant dense<0.000000e+00> : vector<128x64xf32>
    %7 = tpu.matmul %5, %6, %cst_8 {dimension_numbers = #tpu.dot_dimension_numbers<[1], [0], [0], [1], [0, 0, 1, 1], [], []>} : vector<128x64xf32>, vector<64x64xf32>, vector<128x64xf32> -> vector<128x64xf32>
    %cst_9 = arith.constant 0.000000e+00 : f32
    %8 = vector.broadcast %cst_9 : f32 to vector<128x64xf32>
    %9 = arith.maximumf %7, %8 : vector<128x64xf32>
    %cst_10 = arith.constant -1.000000e+00 : f32
    %10 = vector.broadcast %cst_10 : f32 to vector<128x64xf32>
    %11 = arith.mulf %10, %9 : vector<128x64xf32>
    %12 = math.exp %11 : vector<128x64xf32>
    %c0_11 = arith.constant 0 : index
    %c0_12 = arith.constant 0 : index
    %13 = vector.load %arg5[%c0_11, %c0_12] : memref<128x1xf32, #tpu.memory_space<vmem>>, vector<128x1xf32>
    %c0_13 = arith.constant 0 : index
    %c0_14 = arith.constant 0 : index
    %14 = vector.load %arg6[%c0_13, %c0_14] : memref<128x1xf32, #tpu.memory_space<vmem>>, vector<128x1xf32>
    %15 = arith.mulf %4, %12 : vector<128x64xf32>
    %16 = vector.broadcast %13 : vector<128x1xf32> to vector<128x64xf32>
    %17 = arith.mulf %15, %16 : vector<128x64xf32>
    %18 = arith.mulf %9, %12 : vector<128x64xf32>
    %19 = arith.mulf %18, %12 : vector<128x64xf32>
    %20 = vector.broadcast %14 : vector<128x1xf32> to vector<128x64xf32>
    %21 = arith.mulf %19, %20 : vector<128x64xf32>
    %22 = tpu.concatenate %17, %21 in 1 : vector<128x64xf32>, vector<128x64xf32> -> vector<128x128xf32>
    %23 = arith.truncf %22 : vector<128x128xf32> to vector<128x128xbf16>
    %c0_15 = arith.constant 0 : index
    %c0_16 = arith.constant 0 : index
    %24 = vector.load %arg7[%c0_15, %c0_16] : memref<128x128xbf16, #tpu.memory_space<vmem>>, vector<128x128xbf16>
    tpu.vector_store %arg7[%c0_15, %c0_16], %23 {strides = array<i32>} : memref<128x128xbf16, #tpu.memory_space<vmem>>, vector<128x128xbf16>,
    return
  }
  func.func @transform_0(%arg0: i32) -> (i32, i32) {
    %c0_i32 = arith.constant 0 : i32
    %c0_i32_0 = arith.constant 0 : i32
    return %arg0, %c0_i32 : i32, i32
  }
  func.func @transform_1(%arg0: i32) -> (i32, i32) {
    %c0_i32 = arith.constant 0 : i32
    %c0_i32_0 = arith.constant 0 : i32
    return %arg0, %c0_i32 : i32, i32
  }
  func.func @transform_2(%arg0: i32) -> (i32, i32) {
    %c0_i32 = arith.constant 0 : i32
    %c0_i32_0 = arith.constant 0 : i32
    %c0_i32_1 = arith.constant 0 : i32
    return %c0_i32, %c0_i32_0 : i32, i32
  }
  func.func @transform_3(%arg0: i32) -> (i32, i32) {
    %c0_i32 = arith.constant 0 : i32
    %c0_i32_0 = arith.constant 0 : i32
    %c0_i32_1 = arith.constant 0 : i32
    return %c0_i32, %c0_i32_0 : i32, i32
  }
  func.func @transform_4(%arg0: i32) -> (i32, i32) {
    %c0_i32 = arith.constant 0 : i32
    %c0_i32_0 = arith.constant 0 : i32
    return %arg0, %c0_i32 : i32, i32
  }
  func.func @transform_5(%arg0: i32) -> (i32, i32) {
    %c0_i32 = arith.constant 0 : i32
    %c0_i32_0 = arith.constant 0 : i32
    return %arg0, %c0_i32 : i32, i32
  }
  func.func @transform_6(%arg0: i32) -> (i32, i32) {
    %c0_i32 = arith.constant 0 : i32
    %c0_i32_0 = arith.constant 0 : i32
    return %arg0, %c0_i32 : i32, i32
  }
}

</mosaic_0001>

<bundles_post_ra>
// kernel: tpu_custom_call.1
= control target key start
LH: loop header
LB: loop body
LE: loop exit
PB: predicated region body
PF: predicated region fallthrough
CT: control target
= control target key end

     0   :  { %11 = vsyncpa [#allocation3], 0  ;;  %s2453_s0 = inlined_call_operand.vmem [shape: f32[256,64], index: 0, kind: input, shape index: {}]   ;;  %s2454_s1 = inlined_call_operand.vmem [shape: f32[256,64], index: 1, kind: input, shape index: {}]   ;;  %s2455_s2 = inlined_call_operand.vmem [shape: f32[64,64], index: 2, kind: input, shape index: {}]   ;;  %s2456_s3 = inlined_call_operand.vmem [shape: f32[64,64], index: 3, kind: input, shape index: {}]   ;;  %s2457_s4 = inlined_call_operand.vmem [shape: f32[256,1], index: 4, kind: input, shape index: {}]   ;;  %s2458_s5 = inlined_call_operand.vmem [shape: f32[256,1], index: 5, kind: input, shape index: {}]   ;;  %s2459_s6 = inlined_call_operand.hbm [shape: bf16[256,128], index: 6, kind: output, shape index: {}]  }
   0x1   :  { %13 = vsyncpa [#allocation3 + $0x1], 0  ;;  %s1887_s21 = smov 0   ;;  %s1889_s22 = smov 0  }
   0x2   :  { %s1891_s23 = smov 0   ;;  %s1893_s24 = smov 0  }
   0x3 LB: > { %s1908_s25 = sadd.s32 4294967295, %s1846_s24   ;;  %s1378_s26 = sadd.s32 4294967294, %s1846_s24   ;;  %s1846_s24 = sphi %s1893_s24, %s2481_s24   ;;  %s1842_s23 = sphi %s1891_s23, %s2480_s23   ;;  %s1838_s22 = sphi %s1889_s22, %s2479_s22   ;;  %s1834_s21 = sphi %s1887_s21, %s2478_s21  }
   0x4   : > { %s1912_s27 = sadd.s32 1, %s1846_s24   ;;  %s172_s28 = sadd.s32 1, %s1842_s23 }
   0x5   : > { %s169_s29 = ssub.s32 %s1846_s24, %s1912_s27  ;;  %p182_p0 = scmp.ne.s32.totalorder %s1842_s23, %s1838_s22 }
   0x6   : > { %p170_p1 = scmp.eq.s32.totalorder %s169_s29, 0  ;;  %p183_p2 = scmp.eq.s32.totalorder %s1908_s25, 1 }
   0x7   : > { %p188_p3 = scmp.ne.s32.totalorder %s1838_s22, %s1834_s21  ;;  %p189_p4 = scmp.eq.s32.totalorder %s1378_s26, 1 }
   0x8   : > { %s1923_s30 = scalar_select %p170_p1, %s1842_s23, %s172_s28  }
   0x9   : > { %p1925_p5 = por %p183_p2, %p182_p0  ;;  %p1929_p6 = por %p189_p4, %p188_p3 }
   0xa   : > { %p1381_p7 = scmp.ge.s32.totalorder %s1846_s24, 1  ;;  %p249_p8 = scmp.lt.s32.totalorder %s1846_s24, 3 }
   0xc   : > { %p250_p9 = pnand %p1381_p7, %p249_p8 }
   0xe   : > { %253 = sbr.rel (%p250_p9) target bundleno = 443 (0x1bb), region = 44 }
  0x15   : > { %v569_v0 = vld [vmem:[%s2456_s3] sm:$0xff]  ;;  %v570_v1 = vld [vmem:[%s2456_s3 + $0x8] sm:$0xff]  ;;  %v571_v2 = vld [vmem:[%s2456_s3 + $0x10] sm:$0xff]  ;;  %s1383_s15 = sshll.u32 %s1908_s25, 4  ;;  %v1848_v5 = vmov 0   ;;  %vm343_vm0 = vcmask 523264  }
  0x16   : > { %v1652_v3 = vpack.c.bf16 %v570_v1, %v569_v0  ;;  %v572_v4 = vld [vmem:[%s2456_s3 + $0x18] sm:$0xff]  ;;  %p295_p10 = scmp.lt.s32.totalorder %s1383_s15, 31  ;;  %1711 = vset.pattern.permute.xlu1 %v1848_v5  ;;  %1710 = vset.pattern.permute.xlu0 %v1848_v5  ;;  %v573_v7 = vld [vmem:[%s2456_s3 + $0x20] sm:$0xff]  ;;  %v574_v8 = vld [vmem:[%s2456_s3 + $0x28] sm:$0xff]  ;;  %s1850_s28 = smov [#allocation2]  }
  0x17   : > { %v1656_v6 = vpack.c.bf16 %v572_v4, %v571_v2  ;;  %v335_v9 = vld [vmem:[%s2455_s2] sm:$0xff]  ;;  %v336_v10 = vld [vmem:[%s2455_s2 + $0x8] sm:$0xff]  ;;  %v337_v11 = vld [vmem:[%s2455_s2 + $0x10] sm:$0xff]  ;;  %v1660_v14 = vpack.c.bf16 %v574_v8, %v573_v7 }
  0x18   : > { %1653 = vmatprep.subr.bf16.mxu1 %v1652_v3  ;;  %s2483_s15 = smov (!%p295_p10, %s1383_s15), 31  ;;  %v338_v12 = vld [vmem:[%s2455_s2 + $0x18] sm:$0xff]  ;;  %v1636_v13 = vpack.c.bf16 %v336_v10, %v335_v9  ;;  %v339_v16 = vld [vmem:[%s2455_s2 + $0x20] sm:$0xff]  ;;  %v340_v17 = vld [vmem:[%s2455_s2 + $0x28] sm:$0xff] }
  0x19   : > { %1655 = vmatpush3.bf16.msra.mxu1 %v1652_v3  ;;  %s1966_s16 = sshll.u32 %s2483_s15, 3  ;;  %v1640_v15 = vpack.c.bf16 %v338_v12, %v337_v11  ;;  %v575_v18 = vld [vmem:[%s2456_s3 + $0x30] sm:$0xff]  ;;  %v576_v19 = vld [vmem:[%s2456_s3 + $0x38] sm:$0xff]  ;;  %v1644_v21 = vpack.c.bf16 %v340_v17, %v339_v16 }
  0x1a   : > { %1657 = vmatprep.subr.bf16.mxu1 %v1656_v6  ;;  %1637 = vmatprep.subr.bf16.mxu0 %v1636_v13  ;;  %s1984_s11 = scalar_lea.vmem %s2454_s1, %s1966_s16  ;;  %s1990_s14 = scalar_lea.vmem %s2453_s0, %s1966_s16  ;;  %v1664_v22 = vpack.c.bf16 %v576_v19, %v575_v18  ;;  %v341_v23 = vld [vmem:[%s2455_s2 + $0x30] sm:$0xff]  ;;  %v342_v24 = vld [vmem:[%s2455_s2 + $0x38] sm:$0xff] }
  0x1b   : > { %v553_v20 = vld [vmem:[%s1984_s11] sm:$0xff]  ;;  %1639 = vmatpush3.bf16.msra.mxu0 %v1636_v13  ;;  %v1648_v26 = vpack.c.bf16 %v342_v24, %v341_v23  ;;  %s2006_s29 = scalar_lea.vmem %s2457_s4, %s1966_s16  ;;  %v554_v29 = vld [vmem:[%s1984_s11 + $0x8] sm:$0xff]  ;;  %v555_v30 = vld [vmem:[%s1984_s11 + $0x10] sm:$0xff]  ;;  %s2040_s10 = scalar_lea.vmem %s2458_s5, %s1966_s16 }
  0x1c   : > { %1612 = vmatprep.mubr.msk.f32.mxu1 %vm343_vm0, %v553_v20  ;;  %1641 = vmatprep.subr.bf16.mxu0 %v1640_v15  ;;  %v319_v25 = vld [vmem:[%s1990_s14] sm:$0xff]  ;;  %v836_v27 = vld [vmem:[%s2006_s29 + $0x10] sm:$0xff]  ;;  %v837_v31 = vld [vmem:[%s2006_s29 + $0x18] sm:$0xff]  ;;  %s1849_s16 = smov 64  }
  0x1d   : > { %1659 = vmatpush3.bf16.msra.mxu1 %v1656_v6  ;;  %1572 = vmatprep.mubr.msk.f32.mxu0 %vm343_vm0, %v319_v25  ;;  %v834_v28 = vld [vmem:[%s2006_s29] sm:$0xff]  ;;  %v835_v32 = vld [vmem:[%s2006_s29 + $0x8] sm:$0xff]  ;;  %v556_v34 = vld [vmem:[%s1984_s11 + $0x18] sm:$0xff] }
  0x1e   : > { %1661 = vmatprep.subr.bf16.mxu1 %v1660_v14  ;;  %894 = vperm.xlu1 %1711, %v836_v27   ;;  %v320_v33 = vld [vmem:[%s1990_s14 + $0x8] sm:$0xff]  ;;  %v321_v35 = vld [vmem:[%s1990_s14 + $0x10] sm:$0xff]  ;;  %v557_v36 = vld [vmem:[%s1984_s11 + $0x20] sm:$0xff] }
  0x1f   : > { %1643 = vmatpush3.bf16.msra.mxu0 %v1640_v15  ;;  %884 = vperm.xlu0 %1710, %v834_v28   ;;  %v839_v37 = vld [vmem:[%s2006_s29 + $0x28] sm:$0xff]  ;;  %v838_v38 = vld [vmem:[%s2006_s29 + $0x20] sm:$0xff]  ;;  %v322_v39 = vld [vmem:[%s1990_s14 + $0x18] sm:$0xff] }
  0x20   : > { %1645 = vmatprep.subr.bf16.mxu0 %v1644_v21  ;;  %v558_v40 = vld [vmem:[%s1984_s11 + $0x28] sm:$0xff]  ;;  %v323_v41 = vld [vmem:[%s1990_s14 + $0x20] sm:$0xff]  ;;  %v559_v42 = vld [vmem:[%s1984_s11 + $0x30] sm:$0xff] }
  0x21   : > { %1663 = vmatpush3.bf16.msra.mxu1 %v1660_v14  ;;  %v841_v43 = vld [vmem:[%s2006_s29 + $0x38] sm:$0xff]  ;;  %v840_v44 = vld [vmem:[%s2006_s29 + $0x30] sm:$0xff]  ;;  %v324_v45 = vld [vmem:[%s1990_s14 + $0x28] sm:$0xff] }
  0x22   : > { %1665 = vmatprep.subr.bf16.mxu1 %v1664_v22  ;;  %899 = vperm.xlu1 %1711, %v837_v31   ;;  %v560_v46 = vld [vmem:[%s1984_s11 + $0x38] sm:$0xff]  ;;  %v325_v47 = vld [vmem:[%s1990_s14 + $0x30] sm:$0xff]  ;;  %v561_v48 = vld [vmem:[%s1984_s11 + $0x40] sm:$0xff] }
  0x23   : > { %1647 = vmatpush3.bf16.msra.mxu0 %v1644_v21  ;;  %889 = vperm.xlu0 %1710, %v835_v32   ;;  %v851_v49 = vld [vmem:[%s2040_s10 + $0x8] sm:$0xff]  ;;  %v850_v50 = vld [vmem:[%s2040_s10] sm:$0xff]  ;;  %v326_v51 = vld [vmem:[%s1990_s14 + $0x38] sm:$0xff] }
  0x24   : > { %1649 = vmatprep.subr.bf16.mxu0 %v1648_v26  ;;  %v562_v52 = vld [vmem:[%s1984_s11 + $0x48] sm:$0xff]  ;;  %v327_v53 = vld [vmem:[%s1990_s14 + $0x40] sm:$0xff]  ;;  %v563_v54 = vld [vmem:[%s1984_s11 + $0x50] sm:$0xff] }
  0x25   : > { %1667 = vmatpush3.bf16.msra.mxu1 %v1664_v22  ;;  %v853_v55 = vld [vmem:[%s2040_s10 + $0x18] sm:$0xff]  ;;  %v852_v56 = vld [vmem:[%s2040_s10 + $0x10] sm:$0xff]  ;;  %v328_v57 = vld [vmem:[%s1990_s14 + $0x48] sm:$0xff] }
  0x26   : > { %909 = vperm.xlu1 %1711, %v839_v37   ;;  %v564_v58 = vld [vmem:[%s1984_s11 + $0x58] sm:$0xff]  ;;  %v329_v59 = vld [vmem:[%s1990_s14 + $0x50] sm:$0xff]  ;;  %v565_v60 = vld [vmem:[%s1984_s11 + $0x60] sm:$0xff] }
  0x27   : > { %1651 = vmatpush3.bf16.msra.mxu0 %v1648_v26  ;;  %904 = vperm.xlu0 %1710, %v838_v38   ;;  %v855_v61 = vld [vmem:[%s2040_s10 + $0x28] sm:$0xff]  ;;  %v854_v62 = vld [vmem:[%s2040_s10 + $0x20] sm:$0xff]  ;;  %v330_v63 = vld [vmem:[%s1990_s14 + $0x58] sm:$0xff] }
  0x28   : > { %1613 = vmatmul.mubr.msk.f32.vlgmr.msra.gmra.mrb[0].mxu1 %vm343_vm0, %v554_v29  ;;  %v566_v0 = vld [vmem:[%s1984_s11 + $0x68] sm:$0xff]  ;;  %v331_v1 = vld [vmem:[%s1990_s14 + $0x60] sm:$0xff]  ;;  %v567_v2 = vld [vmem:[%s1984_s11 + $0x70] sm:$0xff] }
  0x29   : > { %1615 = vmatprep.mubr.msk.f32.mxu1 %vm343_vm0, %v555_v30  ;;  %v857_v3 = vld [vmem:[%s2040_s10 + $0x38] sm:$0xff]  ;;  %v856_v4 = vld [vmem:[%s2040_s10 + $0x30] sm:$0xff]  ;;  %v332_v5 = vld [vmem:[%s1990_s14 + $0x68] sm:$0xff] }
  0x2a   : > { %1573 = vmatmul.mubr.msk.f32.vlgmr.msra.gmra.mrb[0].mxu0 %vm343_vm0, %v320_v33  ;;  %919 = vperm.xlu1 %1711, %v841_v43   ;;  %v568_v6 = vld [vmem:[%s1984_s11 + $0x78] sm:$0xff]  ;;  %v333_v7 = vld [vmem:[%s1990_s14 + $0x70] sm:$0xff]  ;;  %v859_v8 = vld [vmem:[%s2040_s10 + $0x48] sm:$0xff]  ;;  %s291_s11 = sand.u32 1, %s1838_s22  }
  0x2b   : > { %1575 = vmatprep.mubr.msk.f32.mxu0 %vm343_vm0, %v321_v35  ;;  %914 = vperm.xlu0 %1710, %v840_v44   ;;  %v858_v9 = vld [vmem:[%s2040_s10 + $0x40] sm:$0xff]  ;;  %v334_v10 = vld [vmem:[%s1990_s14 + $0x78] sm:$0xff]  ;;  %v860_v12 = vld [vmem:[%s2040_s10 + $0x50] sm:$0xff]  ;;  %s1382_s12 = sshll.u32 %s291_s11, 6  ;;  %s1460_s14 = sshll.u32 %s1908_s25, 10 }
  0x2c   : > { %1616 = vmatmul.mubr.msk.f32.gmra.mrb[2].mxu1 %vm343_vm0, %v556_v34  ;;  %v861_v11 = vld [vmem:[%s2040_s10 + $0x58] sm:$0xff]  ;;  %v863_v13 = vld [vmem:[%s2040_s10 + $0x68] sm:$0xff]  ;;  %v862_v14 = vld [vmem:[%s2040_s10 + $0x60] sm:$0xff]  ;;  %s2357_s13 = scalar_lea.vmem [#allocation2], %s1382_s12  ;;  %s2403_s20 = scalar_lea.hbm %s2459_s6, %s1460_s14 }
  0x2d   : > { %1618 = vmatprep.mubr.msk.f32.mxu1 %vm343_vm0, %v557_v36  ;;  %v865_v15 = vld [vmem:[%s2040_s10 + $0x78] sm:$0xff]  ;;  %v864_v16 = vld [vmem:[%s2040_s10 + $0x70] sm:$0xff]  ;;  %v843_v17 = vld [vmem:[%s2006_s29 + $0x48] sm:$0xff]  ;;  %s1280_s17 = sshll.u32 %s2357_s13, 4  ;;  %s2410_s25 = scalar_lea.sflag [#allocation3], %s291_s11  ;;  %s2405_s17 = int_to_ptr.vmem [resolvable:$true] %s1280_s17 }
  0x2e   : > { %1576 = vmatmul.mubr.msk.f32.gmra.mrb[2].mxu0 %vm343_vm0, %v322_v39  ;;  %1017 = vperm.xlu1 %1711, %v851_v49   ;;  %v842_v18 = vld [vmem:[%s2006_s29 + $0x40] sm:$0xff]  ;;  %v845_v19 = vld [vmem:[%s2006_s29 + $0x58] sm:$0xff]  ;;  %v844_v20 = vld [vmem:[%s2006_s29 + $0x50] sm:$0xff]  ;;  %s1784_s26 = scalar_lea.vmem %s2405_s17, 1024 }
  0x2f   : > { %1578 = vmatprep.mubr.msk.f32.mxu0 %vm343_vm0, %v323_v41  ;;  %1012 = vperm.xlu0 %1710, %v850_v50   ;;  %v847_v21 = vld [vmem:[%s2006_s29 + $0x68] sm:$0xff]  ;;  %v846_v22 = vld [vmem:[%s2006_s29 + $0x60] sm:$0xff]  ;;  %v849_v23 = vld [vmem:[%s2006_s29 + $0x78] sm:$0xff]  ;;  %p1785_p11 = scmp.ne.s32.totalorder %s2405_s17, %s1784_s26 }
  0x30   : > { %1619 = vmatmul.mubr.msk.f32.gmra.mrb[4].mxu1 %vm343_vm0, %v558_v40  ;;  %v848_v24 = vld [vmem:[%s2006_s29 + $0x70] sm:$0xff]  ;;  %s1788_s29 = sshll.u32 %s1850_s28, 4  ;;  %s1789_s29 = int_to_ptr.vmem [resolvable:$false] %s1788_s29 }
  0x31   : > { %1621 = vmatprep.mubr.msk.f32.mxu1 %vm343_vm0, %v559_v42  ;;  %p1786_p12 = pnand %p1785_p11, %p1925_p5  ;;  %s1790_s9 = scalar_lea.vmem %s1789_s29, 2048 }
  0x32   : > { %1579 = vmatmul.mubr.msk.f32.gmra.mrb[4].mxu0 %vm343_vm0, %v324_v45  ;;  %1027 = vperm.xlu1 %1711, %v853_v55   ;;  %p1791_p0 = scmp.lt.s32.totalorder %s2405_s17, %s1789_s29  ;;  %p1792_p1 = scmp.lt.s32.totalorder %s1790_s9, %s1784_s26 }
  0x33   : > { %1581 = vmatprep.mubr.msk.f32.mxu0 %vm343_vm0, %v325_v47  ;;  %1022 = vperm.xlu0 %1710, %v852_v56   ;;  %p1787_p13 = pneg %p1786_p12 }
  0x34   : > { %1622 = vmatmul.mubr.msk.f32.gmra.mrb[6].mxu1 %vm343_vm0, %v560_v46  ;;  %p1793_p2 = por %p1792_p1, %p1791_p0 }
  0x35   : > { %1624 = vmatprep.mubr.msk.f32.mxu1 %vm343_vm0, %v561_v48 }
  0x36   : > { %1582 = vmatmul.mubr.msk.f32.gmra.mrb[6].mxu0 %vm343_vm0, %v326_v51  ;;  %1037 = vperm.xlu1 %1711, %v855_v61   ;;  %p1794_p3 = pnand %p1793_p2, %p1787_p13 }
  0x37   : > { %1584 = vmatprep.mubr.msk.f32.mxu0 %vm343_vm0, %v327_v53  ;;  %1032 = vperm.xlu0 %1710, %v854_v62  }
  0x38   : > { %1625 = vmatmul.mubr.msk.f32.gmra.mrb[8].mxu1 %vm343_vm0, %v562_v52 }
  0x39   : > { %1627 = vmatprep.mubr.msk.f32.mxu1 %vm343_vm0, %v563_v54 }
  0x3a   : > { %1585 = vmatmul.mubr.msk.f32.gmra.mrb[8].mxu0 %vm343_vm0, %v328_v57  ;;  %1047 = vperm.xlu1 %1711, %v857_v3  }
  0x3b   : > { %1587 = vmatprep.mubr.msk.f32.mxu0 %vm343_vm0, %v329_v59  ;;  %1042 = vperm.xlu0 %1710, %v856_v4  }
  0x3c   : > { %1628 = vmatmul.mubr.msk.f32.gmra.mrb[10].mxu1 %vm343_vm0, %v564_v58 }
  0x3d   : > { %1630 = vmatprep.mubr.msk.f32.mxu1 %vm343_vm0, %v565_v60 }
  0x3e   : > { %1588 = vmatmul.mubr.msk.f32.gmra.mrb[10].mxu0 %vm343_vm0, %v330_v63  ;;  %1057 = vperm.xlu1 %1711, %v859_v8  }
  0x3f   : > { %1590 = vmatprep.mubr.msk.f32.mxu0 %vm343_vm0, %v331_v1  ;;  %1052 = vperm.xlu0 %1710, %v858_v9  }
  0x40   : > { %1631 = vmatmul.mubr.msk.f32.gmra.mrb[12].mxu1 %vm343_vm0, %v566_v0 }
  0x41   : > { %1633 = vmatprep.mubr.msk.f32.mxu1 %vm343_vm0, %v567_v2 }
  0x42   : > { %1591 = vmatmul.mubr.msk.f32.gmra.mrb[12].mxu0 %vm343_vm0, %v332_v5  ;;  %1067 = vperm.xlu1 %1711, %v861_v11  }
  0x43   : > { %1593 = vmatprep.mubr.msk.f32.mxu0 %vm343_vm0, %v333_v7  ;;  %1062 = vperm.xlu0 %1710, %v860_v12  }
  0x44   : > { %1634 = vmatmul.mubr.msk.f32.gmra.mrb[14].mxu1 %vm343_vm0, %v568_v6 }
  0x46   : > { %1594 = vmatmul.mubr.msk.f32.gmra.mrb[14].mxu0 %vm343_vm0, %v334_v10  ;;  %1077 = vperm.xlu1 %1711, %v863_v13  }
  0x47   : > { %1072 = vperm.xlu0 %1710, %v862_v14  }
  0x4a   : > { %1087 = vperm.xlu1 %1711, %v865_v15  }
  0x4b   : > { %1082 = vperm.xlu0 %1710, %v864_v16  }
  0x4e   : > { %929 = vperm.xlu1 %1711, %v843_v17  }
  0x4f   : > { %924 = vperm.xlu0 %1710, %v842_v18  }
  0x52   : > { %939 = vperm.xlu1 %1711, %v845_v19  }
  0x53   : > { %934 = vperm.xlu0 %1710, %v844_v20  }
  0x56   : > { %949 = vperm.xlu1 %1711, %v847_v21  }
  0x57   : > { %944 = vperm.xlu0 %1710, %v846_v22  }
  0x5a   : > { %959 = vperm.xlu1 %1711, %v849_v23  }
  0x5b   : > { %954 = vperm.xlu0 %1710, %v848_v24  }
  0x9d   : > { %v2106_v25 = vpop.permute.xlu1 %894 }
  0x9e   : > { %v2108_v26 = vpop.permute.xlu0 %884 }
  0xa1   : > { %v2110_v27 = vpop.permute.xlu1 %899 }
  0xa2   : > { %v2112_v28 = vpop.permute.xlu0 %889 }
  0xa5   : > { %v2114_v29 = vpop.permute.xlu1 %909 }
  0xa6   : > { %v2116_v30 = vpop.permute.xlu0 %904 }
  0xa9   : > { %v2120_v32 = vpop.permute.xlu1 %919 }
  0xaa   : > { %v2126_v36 = vpop.permute.xlu0 %914 }
  0xab   : > { %2469 = vst [vmem:[#allocation5_spill] sm:$0xff] %v2126_v36 }
  0xad   : > { %v2138_v47 = vpop.permute.xlu1 %1017 }
  0xae   : > { %v2150_v53 = vpop.permute.xlu0 %1012 }
  0xb1   : > { %v2166_v0 = vpop.permute.xlu1 %1027 }
  0xb2   : > { %v2172_v7 = vpop.permute.xlu0 %1022 }
  0xb5   : > { %v2191_v23 = vpop.permute.xlu1 %1037 }
  0xfb   : > { %v2118_v31 = vpop.f32.mrb[0].mxu1 }
  0xfc   : > { %v771_v33 = vmax.f32 %v2118_v31, 0.0  ;;  %v2123_v34 = vpop.f32.mrb[1].mxu1 }
  0xfd   : > { %v770_v35 = vmax.f32 %v2123_v34, 0.0  ;;  %v1574_v38 = vpop.f32.mrb[0].mxu0 }
  0xfe   : > { %v787_v37 = vmul.f32 -1.0, %v771_v33  ;;  %v458_v41 = vpop.f32.mrb[1].mxu0  ;;  %v538_v6 = vmax.f32 %v1574_v38, 0.0 }
  0xff   : > { %v786_v39 = vmul.f32 -1.0, %v770_v35  ;;  %v2132_v40 = vpop.f32.mrb[2].mxu1  ;;  %v537_v9 = vmax.f32 %v458_v41, 0.0 }
 0x100   : > { %v804_v42 = vmul.f32 1.442695, %v787_v37  ;;  %v773_v43 = vmax.f32 %v2132_v40, 0.0  ;;  %v2135_v44 = vpop.f32.mrb[3].mxu1 }
 0x101   : > { %v802_v45 = vmul.f32 1.442695, %v786_v39  ;;  %v772_v46 = vmax.f32 %v2135_v44, 0.0  ;;  %v2142_v49 = vpop.f32.mrb[2].mxu0 }
 0x102   : > { %1752 = vpow2.f32 %v804_v42  ;;  %v789_v48 = vmul.f32 -1.0, %v773_v43  ;;  %v2148_v52 = vpop.f32.mrb[3].mxu0  ;;  %v540_v22 = vmax.f32 %v2142_v49, 0.0 }
 0x103   : > { %1754 = vpow2.f32 %v802_v45  ;;  %v788_v50 = vmul.f32 -1.0, %v772_v46  ;;  %v2146_v51 = vpop.f32.mrb[4].mxu1  ;;  %v539_v38 = vmax.f32 %v2148_v52, 0.0 }
 0x104   : > { %v808_v54 = vmul.f32 1.442695, %v789_v48  ;;  %v775_v55 = vmax.f32 %v2146_v51, 0.0  ;;  %v2153_v56 = vpop.f32.mrb[5].mxu1 }
 0x105   : > { %v806_v57 = vmul.f32 1.442695, %v788_v50  ;;  %v774_v58 = vmax.f32 %v2153_v56, 0.0  ;;  %v2158_v60 = vpop.f32.mrb[4].mxu0  ;;  %v2208_v50 = vpop.permute.xlu0 %1032 }
 0x106   : > { %1756 = vpow2.f32 %v808_v54  ;;  %v791_v59 = vmul.f32 -1.0, %v775_v55  ;;  %v2164_v63 = vpop.f32.mrb[5].mxu0 }
 0x107   : > { %1758 = vpow2.f32 %v806_v57  ;;  %v790_v61 = vmul.f32 -1.0, %v774_v58  ;;  %v2162_v62 = vpop.f32.mrb[6].mxu1 }
 0x108   : > { %v812_v1 = vmul.f32 1.442695, %v791_v59  ;;  %v2465_v2 = vmax.f32 %v2162_v62, 0.0  ;;  %v2169_v3 = vpop.f32.mrb[7].mxu1 }
 0x109   : > { %v810_v4 = vmul.f32 1.442695, %v790_v61  ;;  %v776_v5 = vmax.f32 %v2169_v3, 0.0  ;;  %v2176_v10 = vpop.f32.mrb[6].mxu0 }
 0x10a   : > { %1760 = vpow2.f32 %v812_v1  ;;  %v793_v8 = vmul.f32 -1.0, %v2465_v2  ;;  %v2182_v13 = vpop.f32.mrb[7].mxu0 }
 0x10b   : > { %1762 = vpow2.f32 %v810_v4  ;;  %v792_v11 = vmul.f32 -1.0, %v776_v5  ;;  %v2180_v12 = vpop.f32.mrb[8].mxu1  ;;  %v542_v4 = vmax.f32 %v2158_v60, 0.0 }
 0x10c   : > { %v1753_v14 = vpop.eup %1752  ;;  %v816_v15 = vmul.f32 1.442695, %v793_v8  ;;  %v2463_v16 = vmax.f32 %v2180_v12, 0.0  ;;  %v2185_v17 = vpop.f32.mrb[9].mxu1 }
 0x10d   : > { %v1755_v18 = vpop.eup %1754  ;;  %v814_v19 = vmul.f32 1.442695, %v792_v11  ;;  %v2187_v20 = vmul.f32 %v1753_v14, %v538_v6  ;;  %v2464_v21 = vmax.f32 %v2185_v17, 0.0  ;;  %v2198_v39 = vpop.f32.mrb[8].mxu0  ;;  %v979_v41 = vmul.f32 %v1753_v14, %v771_v33 }
 0x10e   : > { %1764 = vpow2.f32 %v816_v15  ;;  %v2193_v24 = vmul.f32 %v1755_v18, %v537_v9  ;;  %v795_v37 = vmul.f32 -1.0, %v2463_v16  ;;  %v2206_v48 = vpop.f32.mrb[9].mxu0  ;;  %v978_v54 = vmul.f32 %v1755_v18, %v770_v35 }
 0x10f   : > { %1766 = vpow2.f32 %v814_v19  ;;  %v794_v42 = vmul.f32 -1.0, %v2464_v21  ;;  %v2204_v45 = vpop.f32.mrb[10].mxu1  ;;  %v541_v35 = vmax.f32 %v2164_v63, 0.0  ;;  %v995_v9 = vmul.f32 %v1753_v14, %v979_v41  ;;  %v2238_v41 = vpop.permute.xlu1 %1047 }
 0x110   : > { %v1757_v49 = vpop.eup %1756  ;;  %v820_v52 = vmul.f32 1.442695, %v795_v37  ;;  %v2461_v57 = vmax.f32 %v2204_v45, 0.0  ;;  %v2213_v59 = vpop.f32.mrb[11].mxu1  ;;  %v544_v19 = vmax.f32 %v2176_v10, 0.0  ;;  %v994_v37 = vmul.f32 %v1755_v18, %v978_v54 }
 0x111   : > { %v1759_v31 = vpop.eup %1758  ;;  %v818_v33 = vmul.f32 1.442695, %v794_v42  ;;  %v2215_v61 = vmul.f32 %v1757_v49, %v540_v22  ;;  %v2460_v1 = vmax.f32 %v2213_v59, 0.0  ;;  %v2224_v8 = vpop.f32.mrb[10].mxu0  ;;  %v543_v54 = vmax.f32 %v2182_v13, 0.0 }
 0x112   : > { %1768 = vpow2.f32 %v820_v52  ;;  %v2219_v6 = vmul.f32 %v1759_v31, %v539_v38  ;;  %v797_v34 = vmul.f32 -1.0, %v2461_v57  ;;  %v2231_v60 = vpop.f32.mrb[11].mxu0  ;;  %v981_v38 = vmul.f32 %v1757_v49, %v773_v43  ;;  %v2245_v18 = vpop.permute.xlu0 %1042 }
 0x113   : > { %1770 = vpow2.f32 %v818_v33  ;;  %v796_v11 = vmul.f32 -1.0, %v2460_v1  ;;  %v2228_v15 = vpop.f32.mrb[12].mxu1  ;;  %v980_v33 = vmul.f32 %v1759_v31, %v772_v46  ;;  %v1090_v13 = vmul.f32 %v2150_v53, %v994_v37 }
 0x114   : > { %v1761_v22 = vpop.eup %1760  ;;  %v824_v42 = vmul.f32 1.442695, %v797_v34  ;;  %v2462_v63 = vmax.f32 %v2228_v15, 0.0  ;;  %v2236_v52 = vpop.f32.mrb[13].mxu1  ;;  %v1091_v2 = vmul.f32 %v2138_v47, %v995_v9  ;;  %v2470_v9 = vmax.f32 %v2162_v62, 0.0 }
 0x115   : > { %v1763_v14 = vpop.eup %1762  ;;  %v822_v1 = vmul.f32 1.442695, %v796_v11  ;;  %v2242_v10 = vmul.f32 %v1761_v22, %v542_v4  ;;  %v2466_v57 = vmax.f32 %v2236_v52, 0.0  ;;  %v2252_v34 = vpop.f32.mrb[12].mxu0  ;;  %v2471_v62 = vmax.f32 %v2185_v17, 0.0 }
 0x116   : > { %1772 = vpow2.f32 %v824_v42  ;;  %v2247_v40 = vmul.f32 %v1763_v14, %v541_v35  ;;  %v799_v43 = vmul.f32 -1.0, %v2462_v63  ;;  %v982_v44 = vmul.f32 %v1763_v14, %v774_v58  ;;  %v2260_v11 = vpop.f32.mrb[13].mxu0 }
 0x117   : > { %1774 = vpow2.f32 %v822_v1  ;;  %v798_v46 = vmul.f32 -1.0, %v2466_v57  ;;  %v2258_v4 = vpop.f32.mrb[14].mxu1  ;;  %v997_v42 = vmul.f32 %v1757_v49, %v981_v38  ;;  %v983_v63 = vmul.f32 %v1761_v22, %v775_v55 }
 0x118   : > { %v1765_v35 = vpop.eup %1764  ;;  %v828_v16 = vmul.f32 1.442695, %v799_v43  ;;  %v2265_v21 = vpop.f32.mrb[15].mxu1  ;;  %v996_v58 = vmul.f32 %v1759_v31, %v980_v33  ;;  %v785_v51 = vmax.f32 %v2258_v4, 0.0  ;;  %v998_v53 = vmul.f32 %v1763_v14, %v982_v44 }
 0x119   : > { %v1767_v56 = vpop.eup %1766  ;;  %v826_v1 = vmul.f32 1.442695, %v798_v46  ;;  %v2268_v57 = vmul.f32 %v1765_v35, %v544_v19  ;;  %v2275_v55 = vpop.f32.mrb[14].mxu0  ;;  %v1712_v37 = vpack.i.bf16 %v1091_v2, %v1090_v13  ;;  %v999_v47 = vmul.f32 %v1761_v22, %v983_v63 }
 0x11a   : > { %v984_v36 = vmul.f32 %v1767_v56, %v776_v5  ;;  %1776 = vpow2.f32 %v828_v16  ;;  %v2272_v49 = vmul.f32 %v1767_v56, %v543_v54  ;;  %v2277_v38 = vpop.f32.mrb[15].mxu0  ;;  %v1058_v33 = vpop.permute.xlu1 %1057  ;;  %v985_v19 = vmul.f32 %v1765_v35, %v2470_v9 }
 0x11b   : > { %1778 = vpow2.f32 %v826_v1  ;;  %v801_v3 = vmul.f32 -1.0, %v785_v51  ;;  %v784_v5 = vmax.f32 %v2265_v21, 0.0  ;;  %v1053_v43 = vpop.permute.xlu0 %1052  ;;  %1713 = vrot.lane.b32.xlu0 %v1712_v37, %s1849_s16  ;;  %v1092_v2 = vmul.f32 %v2172_v7, %v996_v58 }
 0x11c   : > { %v1769_v31 = vpop.eup %1768  ;;  %v1000_v54 = vmul.f32 %v1767_v56, %v984_v36  ;;  %v1093_v14 = vmul.f32 %v2166_v0, %v997_v42  ;;  %v546_v22 = vmax.f32 %v2198_v39, 0.0  ;;  %v545_v13 = vmax.f32 %v2206_v48, 0.0 }
 0x11d   : > { %v1771_v16 = vpop.eup %1770  ;;  %v832_v44 = vmul.f32 1.442695, %v801_v3  ;;  %v800_v46 = vmul.f32 -1.0, %v784_v5  ;;  %v2472_v36 = vmax.f32 %v2180_v12, 0.0  ;;  %v1094_v7 = vmul.f32 %v2208_v50, %v998_v53 }
 0x11e   : > { %v986_v63 = vmul.f32 %v1771_v16, %v2471_v62  ;;  %v1717_v1 = vpack.i.bf16 %v1093_v14, %v1092_v2  ;;  %v2295_v37 = vmul.f32 %v1769_v31, %v546_v22  ;;  %v1001_v42 = vmul.f32 %v1765_v35, %v985_v19  ;;  %v1068_v2 = vpop.permute.xlu1 %1067 }
 0x11f   : > { %v987_v56 = vmul.f32 %v1769_v31, %v2472_v36  ;;  %1780 = vpow2.f32 %v832_v44  ;;  %v830_v39 = vmul.f32 1.442695, %v800_v46  ;;  %v2298_v17 = vmul.f32 %v1771_v16, %v545_v13  ;;  %v1063_v19 = vpop.permute.xlu0 %1062 }
 0x120   : > { %v1773_v0 = vpop.eup %1772  ;;  %v1002_v9 = vmul.f32 %v1771_v16, %v986_v63  ;;  %v2473_v3 = vmax.f32 %v2204_v45, 0.0  ;;  %1718 = vrot.lane.b32.xlu1 %v1717_v1, %s1849_s16  ;;  %v1095_v12 = vmul.f32 %v2191_v23, %v999_v47  ;;  %v548_v48 = vmax.f32 %v2224_v8, 0.0 }
 0x121   : > { %v1775_v58 = vpop.eup %1774  ;;  %v2474_v50 = vmax.f32 %v2213_v59, 0.0  ;;  %1782 = vpow2.f32 %v830_v39  ;;  %v547_v35 = vmax.f32 %v2231_v60, 0.0  ;;  %v1003_v14 = vmul.f32 %v1769_v31, %v987_v56 }
 0x122   : > { %v989_v62 = vmul.f32 %v1773_v0, %v2473_v3  ;;  %v1722_v22 = vpack.i.bf16 %v1095_v12, %v1094_v7  ;;  %v2308_v16 = vmul.f32 %v1773_v0, %v548_v48  ;;  %v1096_v45 = vmul.f32 %v2245_v18, %v1000_v54 }
 0x123   : > { %v988_v53 = vmul.f32 %v1775_v58, %v2474_v50  ;;  %v2311_v46 = vmul.f32 %v1775_v58, %v547_v35  ;;  %v1097_v23 = vmul.f32 %v2238_v41, %v1001_v42  ;;  %v550_v8 = vmax.f32 %v2252_v34, 0.0  ;;  %v1078_v42 = vpop.permute.xlu1 %1077 }
 0x124   : > { %v1777_v63 = vpop.eup %1776  ;;  %v1005_v47 = vmul.f32 %v1773_v0, %v989_v62  ;;  %v2475_v13 = vmax.f32 %v2228_v15, 0.0  ;;  %1723 = vrot.lane.b32.xlu0 %v1722_v22, %s1849_s16  ;;  %v549_v31 = vmax.f32 %v2260_v11, 0.0  ;;  %v1098_v36 = vmul.f32 %v1053_v43, %v1002_v9 }
 0x125   : > { %v1004_v44 = vmul.f32 %v1775_v58, %v988_v53  ;;  %v1779_v59 = vpop.eup %1778  ;;  %v2476_v18 = vmax.f32 %v2236_v52, 0.0  ;;  %v1727_v56 = vpack.i.bf16 %v1097_v23, %v1096_v45  ;;  %v2321_v1 = vmul.f32 %v1777_v63, %v550_v8  ;;  %v1073_v58 = vpop.permute.xlu0 %1072 }
 0x126   : > { %v991_v60 = vmul.f32 %v1777_v63, %v2475_v13  ;;  %v2323_v41 = vmul.f32 %v1779_v59, %v549_v31  ;;  %v1099_v34 = vmul.f32 %v1058_v33, %v1003_v14  ;;  %v552_v0 = vmax.f32 %v2275_v55, 0.0 }
 0x127   : > { %v990_v54 = vmul.f32 %v1779_v59, %v2476_v18  ;;  %1728 = vrot.lane.b32.xlu1 %v1727_v56, %s1849_s16  ;;  %v1100_v39 = vmul.f32 %v1063_v19, %v1004_v44  ;;  %v551_v43 = vmax.f32 %v2277_v38, 0.0  ;;  %v1101_v52 = vmul.f32 %v1068_v2, %v1005_v47  ;;  %v1088_v38 = vpop.permute.xlu1 %1087 }
 0x128   : > { %v1007_v7 = vmul.f32 %v1777_v63, %v991_v60  ;;  %v1732_v11 = vpack.i.bf16 %v1099_v34, %v1098_v36  ;;  %v963_v13 = vmul.f32 %v2112_v28, %v2187_v20  ;;  %v962_v60 = vmul.f32 %v2108_v26, %v2193_v24 }
 0x129   : > { %v1006_v15 = vmul.f32 %v1779_v59, %v990_v54  ;;  %v1781_v3 = vpop.eup %1780  ;;  %v1737_v55 = vpack.i.bf16 %v1101_v52, %v1100_v39  ;;  %v965_v34 = vmul.f32 %v2110_v27, %v2215_v61  ;;  %v967_v27 = vmul.f32 %v2114_v29, %v2242_v10  ;;  %v2477_v52 = vld [vmem:[#allocation5_spill] sm:$0xff] }
 0x12a   : > { %v1103_v9 = vmul.f32 %v1078_v42, %v1007_v7  ;;  %v993_v12 = vmul.f32 %v1781_v3, %v785_v51  ;;  %1733 = vrot.lane.b32.xlu0 %v1732_v11, %s1849_s16  ;;  %v2331_v33 = vmul.f32 %v1781_v3, %v552_v0  ;;  %v1083_v51 = vpop.permute.xlu0 %1082  ;;  %v964_v0 = vmul.f32 %v2106_v25, %v2219_v6 }
 0x12b   : > { %v1102_v62 = vmul.f32 %v1073_v58, %v1006_v15  ;;  %v1783_v48 = vpop.eup %1782  ;;  %1738 = vrot.lane.b32.xlu1 %v1737_v55, %s1849_s16  ;;  %v930_v63 = vpop.permute.xlu1 %929  ;;  %v966_v25 = vmul.f32 %v2116_v30, %v2247_v40  ;;  %v969_v39 = vmul.f32 %v2120_v32, %v2268_v57 }
 0x12c   : > { %v1009_v53 = vmul.f32 %v1781_v3, %v993_v12  ;;  %v992_v35 = vmul.f32 %v1783_v48, %v784_v5  ;;  %v2335_v19 = vmul.f32 %v1783_v48, %v551_v43  ;;  %v971_v30 = vmul.f32 %v930_v63, %v2295_v37 }
 0x12d   : > { %v1742_v50 = vpack.i.bf16 %v1103_v9, %v1102_v62  ;;  %v968_v9 = vmul.f32 %v2477_v52, %v2272_v49 }
 0x12e   : > { %v1008_v2 = vmul.f32 %v1783_v48, %v992_v35  ;;  %v1105_v4 = vmul.f32 %v1088_v38, %v1009_v53  ;;  %v925_v45 = vpop.permute.xlu0 %924 }
 0x12f   : > { %1743 = vrot.lane.b32.xlu0 %v1742_v50, %s1849_s16  ;;  %v940_v5 = vpop.permute.xlu1 %939  ;;  %v970_v57 = vmul.f32 %v925_v45, %v2298_v17 }
 0x130   : > { %v1104_v14 = vmul.f32 %v1083_v51, %v1008_v2  ;;  %v973_v50 = vmul.f32 %v940_v5, %v2308_v16 }
 0x132   : > { %v1747_v22 = vpack.i.bf16 %v1105_v4, %v1104_v14  ;;  %v935_v21 = vpop.permute.xlu0 %934 }
 0x133   : > { %v950_v23 = vpop.permute.xlu1 %949  ;;  %v972_v49 = vmul.f32 %v935_v21, %v2311_v46 }
 0x134   : > { %1748 = vrot.lane.b32.xlu1 %v1747_v22, %s1849_s16  ;;  %v975_v17 = vmul.f32 %v950_v23, %v2321_v1 }
 0x136   : > { %v945_v44 = vpop.permute.xlu0 %944 }
 0x137   : > { %v2343_v59 = vpop.permute.xlu1 %959  ;;  %v974_v4 = vmul.f32 %v945_v44, %v2323_v41 }
 0x138   : > { %v977_v44 = vmul.f32 %v2343_v59, %v2331_v33 }
 0x13a   : > { %v2340_v8 = vpop.permute.xlu0 %954 }
 0x13b   : > { %v976_v23 = vmul.f32 %v2340_v8, %v2335_v19 }
 0x18d   : > { %v1714_v47 = vpop.permute.xlu0 %1713 }
 0x18e   : > { %v1716_v31 = vunpack.i.h.bf16 %v1714_v47  ;;  %v1715_v36 = vunpack.i.l.bf16 %v1714_v47 }
 0x190   : > { %v1170_v18 = vsel %vm343_vm0, %v962_v60, %v1715_v36  ;;  %v1171_v54 = vsel %vm343_vm0, %v963_v13, %v1716_v31 }
 0x191   : > { %v1464_v56 = vpack.c.bf16 %v1171_v54, %v1170_v18 }
 0x192   : > { %v1719_v7 = vpop.permute.xlu1 %1718 }
 0x193   : > { %v1721_v42 = vunpack.i.h.bf16 %v1719_v7  ;;  %v1720_v15 = vunpack.i.l.bf16 %v1719_v7  ;;  %1465 = vst [vmem:[%s2357_s13] sm:$0xff] %v1464_v56  }
 0x195   : > { %v1172_v26 = vsel %vm343_vm0, %v964_v0, %v1720_v15  ;;  %v1173_v28 = vsel %vm343_vm0, %v965_v34, %v1721_v42 }
 0x196   : > { %v1469_v20 = vpack.c.bf16 %v1173_v28, %v1172_v26  ;;  %v1724_v24 = vpop.permute.xlu0 %1723 }
 0x197   : > { %v1726_v61 = vunpack.i.h.bf16 %v1724_v24  ;;  %v1725_v6 = vunpack.i.l.bf16 %v1724_v24 }
 0x198   : > { %1501 = vst [vmem:[%s2357_s13 + $0x8] sm:$0xff] %v1469_v20  }
 0x199   : > { %v1174_v58 = vsel %vm343_vm0, %v966_v25, %v1725_v6  ;;  %v1175_v11 = vsel %vm343_vm0, %v967_v27, %v1726_v61  ;;  %v1729_v43 = vpop.permute.xlu1 %1728 }
 0x19a   : > { %v1474_v3 = vpack.c.bf16 %v1175_v11, %v1174_v58  ;;  %v1731_v29 = vunpack.i.h.bf16 %v1729_v43  ;;  %v1730_v10 = vunpack.i.l.bf16 %v1729_v43 }
 0x19c   : > { %1502 = vst [vmem:[%s2357_s13 + $0x10] sm:$0xff] %v1474_v3   ;;  %v1176_v40 = vsel %vm343_vm0, %v968_v9, %v1730_v10  ;;  %v1177_v62 = vsel %vm343_vm0, %v969_v39, %v1731_v29  ;;  %v1734_v32 = vpop.permute.xlu0 %1733 }
 0x19d   : > { %v1479_v12 = vpack.c.bf16 %v1177_v62, %v1176_v40  ;;  %v1736_v55 = vunpack.i.h.bf16 %v1734_v32  ;;  %v1735_v48 = vunpack.i.l.bf16 %v1734_v32  ;;  %v1739_v53 = vpop.permute.xlu1 %1738 }
 0x19e   : > { %v1741_v38 = vunpack.i.h.bf16 %v1739_v53  ;;  %v1740_v2 = vunpack.i.l.bf16 %v1739_v53 }
 0x19f   : > { %1503 = vst [vmem:[%s2357_s13 + $0x18] sm:$0xff] %v1479_v12   ;;  %v1178_v37 = vsel %vm343_vm0, %v970_v57, %v1735_v48  ;;  %v1179_v35 = vsel %vm343_vm0, %v971_v30, %v1736_v55 }
 0x1a0   : > { %v1484_v51 = vpack.c.bf16 %v1179_v35, %v1178_v37  ;;  %v1180_v14 = vsel %vm343_vm0, %v972_v49, %v1740_v2  ;;  %v1181_v46 = vsel %vm343_vm0, %v973_v50, %v1741_v38 }
 0x1a1   : > { %v1744_v16 = vpop.permute.xlu0 %1743  ;;  %v1489_v63 = vpack.c.bf16 %v1181_v46, %v1180_v14 }
 0x1a2   : > { %v1746_v22 = vunpack.i.h.bf16 %v1744_v16  ;;  %v1745_v45 = vunpack.i.l.bf16 %v1744_v16  ;;  %1504 = vst [vmem:[%s2357_s13 + $0x20] sm:$0xff] %v1484_v51  }
 0x1a3   : > { %1505 = vst [vmem:[%s2357_s13 + $0x28] sm:$0xff] %v1489_v63  }
 0x1a4   : > { %v1182_v21 = vsel %vm343_vm0, %v974_v4, %v1745_v45  ;;  %v1183_v5 = vsel %vm343_vm0, %v975_v17, %v1746_v22 }
 0x1a5   : > { %v1494_v1 = vpack.c.bf16 %v1183_v5, %v1182_v21 }
 0x1a6   : > { %v1749_v41 = vpop.permute.xlu1 %1748 }
 0x1a7   : > { %1506 = vst [vmem:[%s2357_s13 + $0x30] sm:$0xff] %v1494_v1   ;;  %v1751_v47 = vunpack.i.h.bf16 %v1749_v41  ;;  %v1750_v13 = vunpack.i.l.bf16 %v1749_v41 }
 0x1a9   : > { %v1184_v60 = vsel %vm343_vm0, %v976_v23, %v1750_v13  ;;  %v1185_v31 = vsel %vm343_vm0, %v977_v44, %v1751_v47 }
 0x1aa   : > { %v1499_v36 = vpack.c.bf16 %v1185_v31, %v1184_v60 }
 0x1ac   : > { %1507 = vst [vmem:[%s2357_s13 + $0x38] sm:$0xff] %v1499_v36  }
 0x1ad   : > { %1797 = shalt.err (!%p1794_p3)
}
 0x1ae   : > { %s1798_s15 = scalar_lea.hbm %s2403_s20, 1024  ;;  %s1802_s12 = scalar_lea.hbm %s2459_s6, 2048 }
 0x1af   : > { %p1799_p4 = scmp.ne.s32.totalorder %s2403_s20, %s1798_s15  ;;  %p1803_p9 = scmp.lt.u32.totalorder %s2403_s20, %s2459_s6 }
 0x1b0   : > { %p1804_p10 = scmp.lt.u32.totalorder %s1802_s12, %s1798_s15  ;;  %p1806_p12 = scmp.lt.u32.totalorder %s1798_s15, %s2403_s20 }
 0x1b1   : > { %p1800_p7 = pnand %p1799_p4, %p1925_p5 }
 0x1b2   : > { %p1805_p11 = por %p1804_p10, %p1803_p9 }
 0x1b3   : > { %p1801_p8 = pneg %p1800_p7 }
 0x1b4   : > { %p1807_p13 = por %p1806_p12, %p1805_p11 }
 0x1b6   : > { %p1808_p0 = pnand %p1807_p13, %p1801_p8 }
 0x1b8   : > { %1811 = shalt.err (!%p1808_p0)
}
 0x1b9   : > { %s1851_s18 = smov 4  }
 0x1ba   : > { %1668 = dma.vmem_to_hbm [thread:$0]  (%p1925_p5), %s2405_s17, 1024, %s2403_s20, %s2410_s25, %s1849_s16, %s1849_s16, %s1851_s18  }
 0x1bb PF: > { %p1674_p1 = scmp.ge.s32.totalorder %s1846_s24, 2  ;;  %s1295_s19 = sand.u32 1, %s1834_s21  }
 0x1bc   : > { %s1296_s26 = scalar_lea.sflag [#allocation3], %s1295_s19 }
 0x1bd   : > { %p1671_p2 = pnand %p1674_p1, %p1929_p6 }
 0x1bf   : > { %1829 = dma.done.wait (!%p1671_p2), %s1296_s26, 1024  }
 0x1c0   : > { %1831 = vsyncadd (!%p1671_p2), %s1296_s26, 4294966272  ;;  %p16_p3 = scmp.ge.s32.totalorder %s1912_s27, 4   ;;  %s2478_s21 = smov %s1838_s22 }
 0x1c1   : > { %s2479_s22 = smov %s1842_s23  ;;  %s2480_s23 = smov %s1923_s30 }
 0x1c2   : > { %s2481_s24 = smov %s1912_s27  ;;  %18 = sbr.rel (!%p16_p3) target bundleno = 3 (0x3), region = 88 }
 0x1c9   :  { %1301 = vsyncpa [#allocation3], 1 }
 0x1ca   :  { %1303 = vsyncpa [#allocation3 + $0x1], 1 }

</bundles_post_ra>
